<compile_context>
chip_gen: v7x
topology: tpu7x:2x2x1
jax: 0.10.0
libtpu: 0.0.40
codegen_flags: <defaults>
</compile_context>

<pallas_src>
import math
import jax
import jax.numpy as jnp
from jax import lax
from jax.experimental import pallas as pl
from jax.experimental.pallas import tpu as pltpu


def _make_kernel(H, W, C_pad, Cout, K, bn, halo_alloc):
    HW = H * W
    R = K // 2
    P = 2 * halo_alloc + HW
    KK = K * K

    def kernel(x_ref, w_ref, b_ref, o_ref, xp_ref, st_ref):
        # x_ref  : (bn, C_pad, HW)        flattened NCHW input tile (bn batch items)
        # w_ref  : (Cout, KK*C_pad)       fused per-tap weights, taps folded into contraction
        # b_ref  : (Cout, 1)              fused bias  wpw.T @ bdw + bpw
        # o_ref  : (bn, Cout, HW)
        # xp_ref : (C_pad, P)             flat zero-padded copy of one image (reused per item)
        # st_ref : (KK*C_pad, bn*HW)      stacked, masked taps for the single matmul

        # Column-validity masks (kill W-wraparound of the flat shift).  Hoisted once.
        idx = lax.broadcasted_iota(jnp.int32, (C_pad, HW), 1)
        if W & (W - 1) == 0:
            col = jnp.bitwise_and(idx, W - 1)
        else:
            col = lax.rem(idx, W)
        col_masks = {dw: jnp.logical_and(col + dw >= 0, col + dw < W)
                     for dw in range(-R, R + 1) if dw != 0}

        # Zero halos once per step: halo_alloc % 128 == 0 -> full unmasked vreg stores.
        zeros_halo = jnp.zeros((C_pad, halo_alloc), jnp.float32)
        xp_ref[:, 0:halo_alloc] = zeros_halo
        xp_ref[:, halo_alloc + HW:halo_alloc + HW + halo_alloc] = zeros_halo

        # Build the stacked-tap operand for every batch item in this step.
        for b in range(bn):
            # Interior copy is lane-aligned (halo_alloc % 128 == 0, HW % 128 == 0 typ.).
            xp_ref[:, halo_alloc:halo_alloc + HW] = x_ref[b]
            t = 0
            for kh in range(K):
                for kw in range(K):
                    d = (kh - R) * W + (kw - R)                       # flat shift
                    tap = xp_ref[:, halo_alloc + d:halo_alloc + d + HW]   # (C_pad, HW)
                    dw = kw - R
                    if dw != 0:
                        tap = jnp.where(col_masks[dw], tap, 0.0)
                    # Sublane offset t*C_pad (mult of 8) / lane offset b*HW: aligned store.
                    st_ref[t * C_pad:(t + 1) * C_pad, b * HW:(b + 1) * HW] = tap
                    t += 1

        # One MXU matmul with contraction depth K*K*C_pad, plus fused bias.
        res = jnp.dot(w_ref[...], st_ref[...],
                      preferred_element_type=jnp.float32) + b_ref[...]

        # Lane-dense, lane-aligned stores back to the (bn, Cout, HW) output block.
        for b in range(bn):
            o_ref[b] = res[:, b * HW:(b + 1) * HW].astype(o_ref.dtype)

    return kernel


def separable_conv2d(x_nchw, w_dw, b_dw, w_pw, b_pw, *, kernel_size=3,
                     stride=1, padding=1):
    """x_nchw: (N, C, H, W) float32.  Returns (N, Cout, H, W)."""
    N, C, H, W = x_nchw.shape
    K = kernel_size
    R = K // 2
    if stride != 1 or padding != R:
        raise NotImplementedError("kernel assumes stride=1 and 'same' padding")
    Cout = w_pw.shape[1]
    HW = H * W

    # Pad channels to a sublane multiple (f32: 8) so stacked-tap stores are aligned.
    C_pad = ((C + 7) // 8) * 8
    halo_alloc = max(128, ((R * (W + 1) + 127) // 128) * 128)   # 128-lane aligned halo
    P = 2 * halo_alloc + HW
    KK = K * K
    KKC = KK * C_pad

    # Per-step VMEM estimate: double-buffered in/out blocks + resident weights + scratch.
    def step_bytes(bn):
        blocks = 2 * (bn * C_pad * HW + bn * Cout * HW) * 4
        weights = 2 * (Cout * KKC + Cout) * 4
        scratch = (C_pad * P + KKC * bn * HW) * 4
        return blocks + weights + scratch

    # Whole batch in one grid step when it fits; otherwise one image per step.
    bn = N if step_bytes(N) <= 8 * 1024 * 1024 else 1
    grid_n = N // bn
    vmem_limit = min(int(step_bytes(bn) * 1.5) + (1 << 20), 128 * 1024 * 1024)

    # Free metadata reshape (trailing dims, contiguous) — no transpose in HBM.
    x_flat = x_nchw.reshape(N, C, HW).astype(jnp.float32)
    if C_pad != C:
        x_flat = jnp.pad(x_flat, ((0, 0), (0, C_pad - C), (0, 0)))

    # Fuse depthwise into pointwise on the host (tiny) and fold taps into contraction.
    w_dw_f = w_dw.astype(jnp.float32).reshape(KK, C)                 # (K*K, C)
    w_pw_f = w_pw.astype(jnp.float32)                                # (C, Cout)
    w_eff = w_dw_f[:, None, :] * jnp.transpose(w_pw_f)[None, :, :]   # (K*K, Cout, C)
    if C_pad != C:
        w_eff = jnp.pad(w_eff, ((0, 0), (0, 0), (0, C_pad - C)))
    w_stack = jnp.transpose(w_eff, (1, 0, 2)).reshape(Cout, KKC)     # (Cout, K*K*C_pad)
    b_eff = (jnp.dot(b_dw.astype(jnp.float32), w_pw_f)
             + b_pw.astype(jnp.float32)).reshape(Cout, 1)            # (Cout, 1)

    kernel = _make_kernel(H, W, C_pad, Cout, K, bn, halo_alloc)

    cost = pl.CostEstimate(
        flops=2 * N * HW * C * Cout * KK,
        transcendentals=0,
        bytes_accessed=4 * (x_flat.size + N * Cout * HW + w_stack.size + b_eff.size))

    out_flat = pl.pallas_call(
        kernel,
        out_shape=jax.ShapeDtypeStruct((N, Cout, HW), jnp.float32),
        grid_spec=pltpu.PrefetchScalarGridSpec(
            num_scalar_prefetch=0,
            grid=(grid_n,),
            in_specs=[
                pl.BlockSpec((bn, C_pad, HW), lambda i: (i, 0, 0)),
                pl.BlockSpec((Cout, KKC),     lambda i: (0, 0)),
                pl.BlockSpec((Cout, 1),       lambda i: (0, 0)),
            ],
            out_specs=pl.BlockSpec((bn, Cout, HW), lambda i: (i, 0, 0)),
            scratch_shapes=[
                pltpu.VMEM((C_pad, P), jnp.float32),          # padded image (reused)
                pltpu.VMEM((KKC, bn * HW), jnp.float32),      # stacked taps
            ],
        ),
        compiler_params=pltpu.CompilerParams(
            dimension_semantics=("parallel",),
            vmem_limit_bytes=vmem_limit),
        cost_estimate=cost,
    )(x_flat, w_stack, b_eff)

    return out_flat.reshape(N, Cout, H, W)


def init_params(key, in_channels, out_channels, kernel_size=3):
    """Deterministic xavier_uniform weights + constant(0.2) biases,
    matching the PyTorch module's __init__ shapes."""
    k1, k2 = jax.random.split(key)

    # depthwise: torch weight shape (C, 1, K, K)
    fan_in_dw = 1 * kernel_size * kernel_size
    fan_out_dw = in_channels * kernel_size * kernel_size
    bound_dw = math.sqrt(6.0 / (fan_in_dw + fan_out_dw))
    w_dw_t = jax.random.uniform(
        k1, (in_channels, 1, kernel_size, kernel_size),
        minval=-bound_dw, maxval=bound_dw, dtype=jnp.float32)
    w_dw = jnp.transpose(w_dw_t[:, 0, :, :], (1, 2, 0))        # (K, K, C)

    # pointwise: torch weight shape (Cout, C, 1, 1)
    bound_pw = math.sqrt(6.0 / (in_channels + out_channels))
    w_pw_t = jax.random.uniform(
        k2, (out_channels, in_channels, 1, 1),
        minval=-bound_pw, maxval=bound_pw, dtype=jnp.float32)
    w_pw = jnp.transpose(w_pw_t[:, :, 0, 0], (1, 0))            # (C, Cout)

    b_dw = jnp.full((in_channels,), 0.2, jnp.float32)
    b_pw = jnp.full((out_channels,), 0.2, jnp.float32)
    return w_dw, b_dw, w_pw, b_pw


def _reference(x_nchw, w_dw, b_dw, w_pw, b_pw):
    """Pure-JAX reference (lax.conv): depthwise then pointwise, like the nn.Module."""
    C = x_nchw.shape[1]
    w_dw_oihw = jnp.transpose(w_dw, (2, 0, 1))[:, None, :, :]
    y = jax.lax.conv_general_dilated(
        x_nchw, w_dw_oihw, window_strides=(1, 1), padding=((1, 1), (1, 1)),
        dimension_numbers=("NCHW", "OIHW", "NCHW"), feature_group_count=C)
    y = y + b_dw[None, :, None, None]
    w_pw_oihw = jnp.transpose(w_pw, (1, 0))[:, :, None, None]
    z = jax.lax.conv_general_dilated(
        y, w_pw_oihw, window_strides=(1, 1), padding=((0, 0), (0, 0)),
        dimension_numbers=("NCHW", "OIHW", "NCHW"))
    return z + b_pw[None, :, None, None]


if __name__ == "__main__":
    key = jax.random.PRNGKey(0)
    kx, kp = jax.random.split(key)

    N, C, H, W = 2, 4, 16, 16
    Cout = 8

    x = jax.random.normal(kx, (N, C, H, W), dtype=jnp.float32)
    w_dw, b_dw, w_pw, b_pw = init_params(kp, C, Cout, kernel_size=3)

    out = separable_conv2d(x, w_dw, b_dw, w_pw, b_pw)
    out = jax.block_until_ready(out)

    ref = _reference(x, w_dw, b_dw, w_pw, b_pw)
    assert out.shape == (N, Cout, H, W)
    assert jnp.allclose(out, ref, atol=1e-4, rtol=1e-4), float(jnp.max(jnp.abs(out - ref)))

    print("KERNEL_OK")
</pallas_src>

<mosaic_0001>
module attributes {stable_mosaic.version = 11 : i64} {
  func.func @kernel(%arg0: i32, %arg1: memref<2x8x256xf32, #tpu.memory_space<vmem>>, %arg2: memref<8x72xf32, #tpu.memory_space<vmem>>, %arg3: memref<8x1xf32, #tpu.memory_space<vmem>>, %arg4: memref<2x8x256xf32, #tpu.memory_space<vmem>>, %arg5: memref<8x512xf32, #tpu.memory_space<vmem>>, %arg6: memref<72x512xf32, #tpu.memory_space<vmem>>) attributes {dimension_semantics = [#tpu.dimension_semantics<parallel>], iteration_bounds = array<i64: 1>, scalar_prefetch = 0 : i64, scratch_operands = 2 : i64, tpu.core_type = #tpu.core_type<tc>, window_params = [{transform_indices = @transform_0, window_bounds = array<i64: 2, 8, 256>}, {pipeline_mode = #tpu.pipeline_mode<synchronous>, transform_indices = @transform_1, window_bounds = array<i64: 8, 72>}, {pipeline_mode = #tpu.pipeline_mode<synchronous>, transform_indices = @transform_2, window_bounds = array<i64: 8, 1>}, {transform_indices = @transform_3, window_bounds = array<i64: 2, 8, 256>}]} {
    %0 = tpu.iota {dimensions = array<i32: 1>} : vector<8x256xi32>
    %c15_i32 = arith.constant 15 : i32
    %1 = vector.broadcast %c15_i32 : i32 to vector<8x256xi32>
    %2 = arith.andi %0, %1 : vector<8x256xi32>
    %c-1_i32 = arith.constant -1 : i32
    %3 = vector.broadcast %c-1_i32 : i32 to vector<8x256xi32>
    %4 = arith.addi %2, %3 : vector<8x256xi32>
    %c0_i32 = arith.constant 0 : i32
    %5 = vector.broadcast %c0_i32 : i32 to vector<8x256xi32>
    %6 = arith.cmpi sge, %4, %5 : vector<8x256xi32>
    %c-1_i32_0 = arith.constant -1 : i32
    %7 = vector.broadcast %c-1_i32_0 : i32 to vector<8x256xi32>
    %8 = arith.addi %2, %7 : vector<8x256xi32>
    %c16_i32 = arith.constant 16 : i32
    %9 = vector.broadcast %c16_i32 : i32 to vector<8x256xi32>
    %10 = arith.cmpi slt, %8, %9 : vector<8x256xi32>
    %11 = arith.andi %6, %10 : vector<8x256xi1>
    %c1_i32 = arith.constant 1 : i32
    %12 = vector.broadcast %c1_i32 : i32 to vector<8x256xi32>
    %13 = arith.addi %2, %12 : vector<8x256xi32>
    %c0_i32_1 = arith.constant 0 : i32
    %14 = vector.broadcast %c0_i32_1 : i32 to vector<8x256xi32>
    %15 = arith.cmpi sge, %13, %14 : vector<8x256xi32>
    %c1_i32_2 = arith.constant 1 : i32
    %16 = vector.broadcast %c1_i32_2 : i32 to vector<8x256xi32>
    %17 = arith.addi %2, %16 : vector<8x256xi32>
    %c16_i32_3 = arith.constant 16 : i32
    %18 = vector.broadcast %c16_i32_3 : i32 to vector<8x256xi32>
    %19 = arith.cmpi slt, %17, %18 : vector<8x256xi32>
    %20 = arith.andi %15, %19 : vector<8x256xi1>
    %cst = arith.constant 0.000000e+00 : f32
    %21 = vector.broadcast %cst : f32 to vector<8x128xf32>
    %c0 = arith.constant 0 : index
    %c0_4 = arith.constant 0 : index
    %22 = vector.load %arg5[%c0, %c0_4] : memref<8x512xf32, #tpu.memory_space<vmem>>, vector<8x128xf32>
    tpu.vector_store %arg5[%c0, %c0_4], %21 {strides = array<i32>} : memref<8x512xf32, #tpu.memory_space<vmem>>, vector<8x128xf32>,
    %c0_5 = arith.constant 0 : index
    %c384 = arith.constant 384 : index
    %23 = vector.load %arg5[%c0_5, %c384] : memref<8x512xf32, #tpu.memory_space<vmem>>, vector<8x128xf32>
    tpu.vector_store %arg5[%c0_5, %c384], %21 {strides = array<i32>} : memref<8x512xf32, #tpu.memory_space<vmem>>, vector<8x128xf32>,
    %c0_6 = arith.constant 0 : index
    %c0_7 = arith.constant 0 : index
    %c0_8 = arith.constant 0 : index
    %24 = vector.load %arg1[%c0_6, %c0_7, %c0_8] : memref<2x8x256xf32, #tpu.memory_space<vmem>>, vector<1x8x256xf32>
    %25 = vector.shape_cast %24 : vector<1x8x256xf32> to vector<8x256xf32>
    %c0_9 = arith.constant 0 : index
    %c128 = arith.constant 128 : index
    %26 = vector.load %arg5[%c0_9, %c128] : memref<8x512xf32, #tpu.memory_space<vmem>>, vector<8x256xf32>
    tpu.vector_store %arg5[%c0_9, %c128], %25 {strides = array<i32>} : memref<8x512xf32, #tpu.memory_space<vmem>>, vector<8x256xf32>,
    %c0_10 = arith.constant 0 : index
    %c111 = arith.constant 111 : index
    %27 = vector.load %arg5[%c0_10, %c111] : memref<8x512xf32, #tpu.memory_space<vmem>>, vector<8x256xf32>
    %cst_11 = arith.constant 0.000000e+00 : f32
    %28 = vector.broadcast %cst_11 : f32 to vector<8x256xf32>
    %29 = arith.select %11, %27, %28 : vector<8x256xi1>, vector<8x256xf32>
    %c0_12 = arith.constant 0 : index
    %c0_13 = arith.constant 0 : index
    %30 = vector.load %arg6[%c0_12, %c0_13] : memref<72x512xf32, #tpu.memory_space<vmem>>, vector<8x256xf32>
    tpu.vector_store %arg6[%c0_12, %c0_13], %29 {strides = array<i32>} : memref<72x512xf32, #tpu.memory_space<vmem>>, vector<8x256xf32>,
    %c0_14 = arith.constant 0 : index
    %c112 = arith.constant 112 : index
    %31 = vector.load %arg5[%c0_14, %c112] : memref<8x512xf32, #tpu.memory_space<vmem>>, vector<8x256xf32>
    %c8 = arith.constant 8 : index
    %c0_15 = arith.constant 0 : index
    %32 = vector.load %arg6[%c8, %c0_15] : memref<72x512xf32, #tpu.memory_space<vmem>>, vector<8x256xf32>
    tpu.vector_store %arg6[%c8, %c0_15], %31 {strides = array<i32>} : memref<72x512xf32, #tpu.memory_space<vmem>>, vector<8x256xf32>,
    %c0_16 = arith.constant 0 : index
    %c113 = arith.constant 113 : index
    %33 = vector.load %arg5[%c0_16, %c113] : memref<8x512xf32, #tpu.memory_space<vmem>>, vector<8x256xf32>
    %cst_17 = arith.constant 0.000000e+00 : f32
    %34 = vector.broadcast %cst_17 : f32 to vector<8x256xf32>
    %35 = arith.select %20, %33, %34 : vector<8x256xi1>, vector<8x256xf32>
    %c16 = arith.constant 16 : index
    %c0_18 = arith.constant 0 : index
    %36 = vector.load %arg6[%c16, %c0_18] : memref<72x512xf32, #tpu.memory_space<vmem>>, vector<8x256xf32>
    tpu.vector_store %arg6[%c16, %c0_18], %35 {strides = array<i32>} : memref<72x512xf32, #tpu.memory_space<vmem>>, vector<8x256xf32>,
    %c0_19 = arith.constant 0 : index
    %c127 = arith.constant 127 : index
    %37 = vector.load %arg5[%c0_19, %c127] : memref<8x512xf32, #tpu.memory_space<vmem>>, vector<8x256xf32>
    %cst_20 = arith.constant 0.000000e+00 : f32
    %38 = vector.broadcast %cst_20 : f32 to vector<8x256xf32>
    %39 = arith.select %11, %37, %38 : vector<8x256xi1>, vector<8x256xf32>
    %c24 = arith.constant 24 : index
    %c0_21 = arith.constant 0 : index
    %40 = vector.load %arg6[%c24, %c0_21] : memref<72x512xf32, #tpu.memory_space<vmem>>, vector<8x256xf32>
    tpu.vector_store %arg6[%c24, %c0_21], %39 {strides = array<i32>} : memref<72x512xf32, #tpu.memory_space<vmem>>, vector<8x256xf32>,
    %c0_22 = arith.constant 0 : index
    %c128_23 = arith.constant 128 : index
    %41 = vector.load %arg5[%c0_22, %c128_23] : memref<8x512xf32, #tpu.memory_space<vmem>>, vector<8x256xf32>
    %c32 = arith.constant 32 : index
    %c0_24 = arith.constant 0 : index
    %42 = vector.load %arg6[%c32, %c0_24] : memref<72x512xf32, #tpu.memory_space<vmem>>, vector<8x256xf32>
    tpu.vector_store %arg6[%c32, %c0_24], %41 {strides = array<i32>} : memref<72x512xf32, #tpu.memory_space<vmem>>, vector<8x256xf32>,
    %c0_25 = arith.constant 0 : index
    %c129 = arith.constant 129 : index
    %43 = vector.load %arg5[%c0_25, %c129] : memref<8x512xf32, #tpu.memory_space<vmem>>, vector<8x256xf32>
    %cst_26 = arith.constant 0.000000e+00 : f32
    %44 = vector.broadcast %cst_26 : f32 to vector<8x256xf32>
    %45 = arith.select %20, %43, %44 : vector<8x256xi1>, vector<8x256xf32>
    %c40 = arith.constant 40 : index
    %c0_27 = arith.constant 0 : index
    %46 = vector.load %arg6[%c40, %c0_27] : memref<72x512xf32, #tpu.memory_space<vmem>>, vector<8x256xf32>
    tpu.vector_store %arg6[%c40, %c0_27], %45 {strides = array<i32>} : memref<72x512xf32, #tpu.memory_space<vmem>>, vector<8x256xf32>,
    %c0_28 = arith.constant 0 : index
    %c143 = arith.constant 143 : index
    %47 = vector.load %arg5[%c0_28, %c143] : memref<8x512xf32, #tpu.memory_space<vmem>>, vector<8x256xf32>
    %cst_29 = arith.constant 0.000000e+00 : f32
    %48 = vector.broadcast %cst_29 : f32 to vector<8x256xf32>
    %49 = arith.select %11, %47, %48 : vector<8x256xi1>, vector<8x256xf32>
    %c48 = arith.constant 48 : index
    %c0_30 = arith.constant 0 : index
    %50 = vector.load %arg6[%c48, %c0_30] : memref<72x512xf32, #tpu.memory_space<vmem>>, vector<8x256xf32>
    tpu.vector_store %arg6[%c48, %c0_30], %49 {strides = array<i32>} : memref<72x512xf32, #tpu.memory_space<vmem>>, vector<8x256xf32>,
    %c0_31 = arith.constant 0 : index
    %c144 = arith.constant 144 : index
    %51 = vector.load %arg5[%c0_31, %c144] : memref<8x512xf32, #tpu.memory_space<vmem>>, vector<8x256xf32>
    %c56 = arith.constant 56 : index
    %c0_32 = arith.constant 0 : index
    %52 = vector.load %arg6[%c56, %c0_32] : memref<72x512xf32, #tpu.memory_space<vmem>>, vector<8x256xf32>
    tpu.vector_store %arg6[%c56, %c0_32], %51 {strides = array<i32>} : memref<72x512xf32, #tpu.memory_space<vmem>>, vector<8x256xf32>,
    %c0_33 = arith.constant 0 : index
    %c145 = arith.constant 145 : index
    %53 = vector.load %arg5[%c0_33, %c145] : memref<8x512xf32, #tpu.memory_space<vmem>>, vector<8x256xf32>
    %cst_34 = arith.constant 0.000000e+00 : f32
    %54 = vector.broadcast %cst_34 : f32 to vector<8x256xf32>
    %55 = arith.select %20, %53, %54 : vector<8x256xi1>, vector<8x256xf32>
    %c64 = arith.constant 64 : index
    %c0_35 = arith.constant 0 : index
    %56 = vector.load %arg6[%c64, %c0_35] : memref<72x512xf32, #tpu.memory_space<vmem>>, vector<8x256xf32>
    tpu.vector_store %arg6[%c64, %c0_35], %55 {strides = array<i32>} : memref<72x512xf32, #tpu.memory_space<vmem>>, vector<8x256xf32>,
    %c1 = arith.constant 1 : index
    %c0_36 = arith.constant 0 : index
    %c0_37 = arith.constant 0 : index
    %57 = vector.load %arg1[%c1, %c0_36, %c0_37] : memref<2x8x256xf32, #tpu.memory_space<vmem>>, vector<1x8x256xf32>
    %58 = vector.shape_cast %57 : vector<1x8x256xf32> to vector<8x256xf32>
    %c0_38 = arith.constant 0 : index
    %c128_39 = arith.constant 128 : index
    %59 = vector.load %arg5[%c0_38, %c128_39] : memref<8x512xf32, #tpu.memory_space<vmem>>, vector<8x256xf32>
    tpu.vector_store %arg5[%c0_38, %c128_39], %58 {strides = array<i32>} : memref<8x512xf32, #tpu.memory_space<vmem>>, vector<8x256xf32>,
    %c0_40 = arith.constant 0 : index
    %c111_41 = arith.constant 111 : index
    %60 = vector.load %arg5[%c0_40, %c111_41] : memref<8x512xf32, #tpu.memory_space<vmem>>, vector<8x256xf32>
    %cst_42 = arith.constant 0.000000e+00 : f32
    %61 = vector.broadcast %cst_42 : f32 to vector<8x256xf32>
    %62 = arith.select %11, %60, %61 : vector<8x256xi1>, vector<8x256xf32>
    %c0_43 = arith.constant 0 : index
    %c256 = arith.constant 256 : index
    %63 = vector.load %arg6[%c0_43, %c256] : memref<72x512xf32, #tpu.memory_space<vmem>>, vector<8x256xf32>
    tpu.vector_store %arg6[%c0_43, %c256], %62 {strides = array<i32>} : memref<72x512xf32, #tpu.memory_space<vmem>>, vector<8x256xf32>,
    %c0_44 = arith.constant 0 : index
    %c112_45 = arith.constant 112 : index
    %64 = vector.load %arg5[%c0_44, %c112_45] : memref<8x512xf32, #tpu.memory_space<vmem>>, vector<8x256xf32>
    %c8_46 = arith.constant 8 : index
    %c256_47 = arith.constant 256 : index
    %65 = vector.load %arg6[%c8_46, %c256_47] : memref<72x512xf32, #tpu.memory_space<vmem>>, vector<8x256xf32>
    tpu.vector_store %arg6[%c8_46, %c256_47], %64 {strides = array<i32>} : memref<72x512xf32, #tpu.memory_space<vmem>>, vector<8x256xf32>,
    %c0_48 = arith.constant 0 : index
    %c113_49 = arith.constant 113 : index
    %66 = vector.load %arg5[%c0_48, %c113_49] : memref<8x512xf32, #tpu.memory_space<vmem>>, vector<8x256xf32>
    %cst_50 = arith.constant 0.000000e+00 : f32
    %67 = vector.broadcast %cst_50 : f32 to vector<8x256xf32>
    %68 = arith.select %20, %66, %67 : vector<8x256xi1>, vector<8x256xf32>
    %c16_51 = arith.constant 16 : index
    %c256_52 = arith.constant 256 : index
    %69 = vector.load %arg6[%c16_51, %c256_52] : memref<72x512xf32, #tpu.memory_space<vmem>>, vector<8x256xf32>
    tpu.vector_store %arg6[%c16_51, %c256_52], %68 {strides = array<i32>} : memref<72x512xf32, #tpu.memory_space<vmem>>, vector<8x256xf32>,
    %c0_53 = arith.constant 0 : index
    %c127_54 = arith.constant 127 : index
    %70 = vector.load %arg5[%c0_53, %c127_54] : memref<8x512xf32, #tpu.memory_space<vmem>>, vector<8x256xf32>
    %cst_55 = arith.constant 0.000000e+00 : f32
    %71 = vector.broadcast %cst_55 : f32 to vector<8x256xf32>
    %72 = arith.select %11, %70, %71 : vector<8x256xi1>, vector<8x256xf32>
    %c24_56 = arith.constant 24 : index
    %c256_57 = arith.constant 256 : index
    %73 = vector.load %arg6[%c24_56, %c256_57] : memref<72x512xf32, #tpu.memory_space<vmem>>, vector<8x256xf32>
    tpu.vector_store %arg6[%c24_56, %c256_57], %72 {strides = array<i32>} : memref<72x512xf32, #tpu.memory_space<vmem>>, vector<8x256xf32>,
    %c0_58 = arith.constant 0 : index
    %c128_59 = arith.constant 128 : index
    %74 = vector.load %arg5[%c0_58, %c128_59] : memref<8x512xf32, #tpu.memory_space<vmem>>, vector<8x256xf32>
    %c32_60 = arith.constant 32 : index
    %c256_61 = arith.constant 256 : index
    %75 = vector.load %arg6[%c32_60, %c256_61] : memref<72x512xf32, #tpu.memory_space<vmem>>, vector<8x256xf32>
    tpu.vector_store %arg6[%c32_60, %c256_61], %74 {strides = array<i32>} : memref<72x512xf32, #tpu.memory_space<vmem>>, vector<8x256xf32>,
    %c0_62 = arith.constant 0 : index
    %c129_63 = arith.constant 129 : index
    %76 = vector.load %arg5[%c0_62, %c129_63] : memref<8x512xf32, #tpu.memory_space<vmem>>, vector<8x256xf32>
    %cst_64 = arith.constant 0.000000e+00 : f32
    %77 = vector.broadcast %cst_64 : f32 to vector<8x256xf32>
    %78 = arith.select %20, %76, %77 : vector<8x256xi1>, vector<8x256xf32>
    %c40_65 = arith.constant 40 : index
    %c256_66 = arith.constant 256 : index
    %79 = vector.load %arg6[%c40_65, %c256_66] : memref<72x512xf32, #tpu.memory_space<vmem>>, vector<8x256xf32>
    tpu.vector_store %arg6[%c40_65, %c256_66], %78 {strides = array<i32>} : memref<72x512xf32, #tpu.memory_space<vmem>>, vector<8x256xf32>,
    %c0_67 = arith.constant 0 : index
    %c143_68 = arith.constant 143 : index
    %80 = vector.load %arg5[%c0_67, %c143_68] : memref<8x512xf32, #tpu.memory_space<vmem>>, vector<8x256xf32>
    %cst_69 = arith.constant 0.000000e+00 : f32
    %81 = vector.broadcast %cst_69 : f32 to vector<8x256xf32>
    %82 = arith.select %11, %80, %81 : vector<8x256xi1>, vector<8x256xf32>
    %c48_70 = arith.constant 48 : index
    %c256_71 = arith.constant 256 : index
    %83 = vector.load %arg6[%c48_70, %c256_71] : memref<72x512xf32, #tpu.memory_space<vmem>>, vector<8x256xf32>
    tpu.vector_store %arg6[%c48_70, %c256_71], %82 {strides = array<i32>} : memref<72x512xf32, #tpu.memory_space<vmem>>, vector<8x256xf32>,
    %c0_72 = arith.constant 0 : index
    %c144_73 = arith.constant 144 : index
    %84 = vector.load %arg5[%c0_72, %c144_73] : memref<8x512xf32, #tpu.memory_space<vmem>>, vector<8x256xf32>
    %c56_74 = arith.constant 56 : index
    %c256_75 = arith.constant 256 : index
    %85 = vector.load %arg6[%c56_74, %c256_75] : memref<72x512xf32, #tpu.memory_space<vmem>>, vector<8x256xf32>
    tpu.vector_store %arg6[%c56_74, %c256_75], %84 {strides = array<i32>} : memref<72x512xf32, #tpu.memory_space<vmem>>, vector<8x256xf32>,
    %c0_76 = arith.constant 0 : index
    %c145_77 = arith.constant 145 : index
    %86 = vector.load %arg5[%c0_76, %c145_77] : memref<8x512xf32, #tpu.memory_space<vmem>>, vector<8x256xf32>
    %cst_78 = arith.constant 0.000000e+00 : f32
    %87 = vector.broadcast %cst_78 : f32 to vector<8x256xf32>
    %88 = arith.select %20, %86, %87 : vector<8x256xi1>, vector<8x256xf32>
    %c64_79 = arith.constant 64 : index
    %c256_80 = arith.constant 256 : index
    %89 = vector.load %arg6[%c64_79, %c256_80] : memref<72x512xf32, #tpu.memory_space<vmem>>, vector<8x256xf32>
    tpu.vector_store %arg6[%c64_79, %c256_80], %88 {strides = array<i32>} : memref<72x512xf32, #tpu.memory_space<vmem>>, vector<8x256xf32>,
    %c0_81 = arith.constant 0 : index
    %c0_82 = arith.constant 0 : index
    %90 = vector.load %arg2[%c0_81, %c0_82] : memref<8x72xf32, #tpu.memory_space<vmem>>, vector<8x72xf32>
    %c0_83 = arith.constant 0 : index
    %c0_84 = arith.constant 0 : index
    %91 = vector.load %arg6[%c0_83, %c0_84] : memref<72x512xf32, #tpu.memory_space<vmem>>, vector<72x512xf32>
    %cst_85 = arith.constant dense<0.000000e+00> : vector<8x512xf32>
    %92 = tpu.matmul %90, %91, %cst_85 {dimension_numbers = #tpu.dot_dimension_numbers<[1], [0], [0], [1], [0, 0, 1, 1], [], []>} : vector<8x72xf32>, vector<72x512xf32>, vector<8x512xf32> -> vector<8x512xf32>
    %c0_86 = arith.constant 0 : index
    %c0_87 = arith.constant 0 : index
    %93 = vector.load %arg3[%c0_86, %c0_87] : memref<8x1xf32, #tpu.memory_space<vmem>>, vector<8x1xf32>
    %94 = vector.broadcast %93 : vector<8x1xf32> to vector<8x512xf32>
    %95 = arith.addf %92, %94 : vector<8x512xf32>
    %96 = vector.extract_strided_slice %95 {offsets = [0, 0], sizes = [8, 256], strides = [1, 1]} : vector<8x512xf32> to vector<8x256xf32>
    %c0_88 = arith.constant 0 : index
    %c0_89 = arith.constant 0 : index
    %c0_90 = arith.constant 0 : index
    %97 = vector.load %arg4[%c0_88, %c0_89, %c0_90] : memref<2x8x256xf32, #tpu.memory_space<vmem>>, vector<1x8x256xf32>
    %98 = vector.shape_cast %97 : vector<1x8x256xf32> to vector<8x256xf32>
    %99 = vector.shape_cast %96 : vector<8x256xf32> to vector<1x8x256xf32>
    tpu.vector_store %arg4[%c0_88, %c0_89, %c0_90], %99 {strides = array<i32>} : memref<2x8x256xf32, #tpu.memory_space<vmem>>, vector<1x8x256xf32>,
    %100 = vector.extract_strided_slice %95 {offsets = [0, 256], sizes = [8, 256], strides = [1, 1]} : vector<8x512xf32> to vector<8x256xf32>
    %c1_91 = arith.constant 1 : index
    %c0_92 = arith.constant 0 : index
    %c0_93 = arith.constant 0 : index
    %101 = vector.load %arg4[%c1_91, %c0_92, %c0_93] : memref<2x8x256xf32, #tpu.memory_space<vmem>>, vector<1x8x256xf32>
    %102 = vector.shape_cast %101 : vector<1x8x256xf32> to vector<8x256xf32>
    %103 = vector.shape_cast %100 : vector<8x256xf32> to vector<1x8x256xf32>
    tpu.vector_store %arg4[%c1_91, %c0_92, %c0_93], %103 {strides = array<i32>} : memref<2x8x256xf32, #tpu.memory_space<vmem>>, vector<1x8x256xf32>,
    return
  }
  func.func @transform_0(%arg0: i32) -> (i32, i32, i32) {
    %c0_i32 = arith.constant 0 : i32
    %c0_i32_0 = arith.constant 0 : i32
    %c0_i32_1 = arith.constant 0 : i32
    return %arg0, %c0_i32, %c0_i32_0 : i32, i32, i32
  }
  func.func @transform_1(%arg0: i32) -> (i32, i32) {
    %c0_i32 = arith.constant 0 : i32
    %c0_i32_0 = arith.constant 0 : i32
    %c0_i32_1 = arith.constant 0 : i32
    return %c0_i32, %c0_i32_0 : i32, i32
  }
  func.func @transform_2(%arg0: i32) -> (i32, i32) {
    %c0_i32 = arith.constant 0 : i32
    %c0_i32_0 = arith.constant 0 : i32
    %c0_i32_1 = arith.constant 0 : i32
    return %c0_i32, %c0_i32_0 : i32, i32
  }
  func.func @transform_3(%arg0: i32) -> (i32, i32, i32) {
    %c0_i32 = arith.constant 0 : i32
    %c0_i32_0 = arith.constant 0 : i32
    %c0_i32_1 = arith.constant 0 : i32
    return %arg0, %c0_i32, %c0_i32_0 : i32, i32, i32
  }
}

</mosaic_0001>

<bundles_post_ra>
// kernel: tpu_custom_call.1
= control target key start
LH: loop header
LB: loop body
LE: loop exit
PB: predicated region body
PF: predicated region fallthrough
CT: control target
= control target key end

     0   :  { %8 = vsyncpa [#allocation5], 0  ;;  %s1043_s0 = inlined_call_operand.hbm [shape: f32[2,8,256], index: 0, kind: input, shape index: {}]   ;;  %s1044_s1 = inlined_call_operand.vmem [shape: f32[8,72], index: 1, kind: input, shape index: {}]   ;;  %s1045_s2 = inlined_call_operand.vmem [shape: f32[8,1], index: 2, kind: input, shape index: {}]   ;;  %s1046_s3 = inlined_call_operand.hbm [shape: f32[2,8,256], index: 3, kind: output, shape index: {}]  }
   0x1   :  { %9 = vsyncpa [#allocation6], 0  ;;  %s847_s12 = smov [#allocation4]   ;;  %s799_s16 = scalar_lea.hbm %s1043_s0, 512 }
   0x2   :  { %s15_s13 = sshll.u32 %s847_s12, 4  ;;  %p800_p0 = scmp.ne.s32.totalorder %s1043_s0, %s799_s16  ;;  %s16_s13 = int_to_ptr.vmem [resolvable:$true] %s15_s13 }
   0x3   :  { %p803_p1 = scmp.lt.u32.totalorder %s799_s16, %s1043_s0 }
   0x5   :  { %p805_p2 = pnand %p803_p1, %p800_p0 }
   0x7   :  { %808 = shalt.err (!%p805_p2)
}
   0x8   :  { %s809_s21 = scalar_lea.vmem %s16_s13, 512  ;;  %p814_p4 = scmp.lt.s32.totalorder %s16_s13, %s16_s13 }
   0x9   :  { %p810_p3 = scmp.ne.s32.totalorder %s16_s13, %s809_s21  ;;  %p815_p5 = scmp.lt.s32.totalorder %s809_s21, %s809_s21 }
   0xb   :  { %p816_p6 = por %p815_p5, %p814_p4 }
   0xd   :  { %p817_p7 = pnand %p816_p6, %p810_p3 }
   0xf   :  { %820 = shalt.err (!%p817_p7)
}
  0x10   :  { %s848_s22 = smov 256   ;;  %s849_s23 = smov 16  }
  0x11   :  { %21 = dma.hbm_to_vmem [thread:$0]  %s1043_s0, 512, %s16_s13, [#allocation5], %s848_s22, %s848_s22, %s849_s23  }
  0x12   :  { %843 = dma.done.wait [#allocation5], 512  }
  0x13   :  { %844 = vsyncadd [#allocation5], 4294966784  ;;  %v850_v0 = vmov 0.0   ;;  %s851_s26 = smov 17   ;;  %v897_v1 = vld [vmem:[#allocation4 + $0x10] sm:$0xff]  ;;  %v899_v2 = vld [vmem:[#allocation4 + $0x18] sm:$0xff]  ;;  %v29_v12 = vlaneseq }
  0x14   :  { %500 = vmatprep.mubr.f32.mxu0 %v850_v0  ;;  %571 = vmatprep.mubr.f32.mxu1 %v850_v0  ;;  %v901_v3 = vld [vmem:[#allocation4] sm:$0xff]  ;;  %v708_v4 = vpack.i.bf16 %v899_v2, %v897_v1  ;;  %v905_v5 = vld [vmem:[#allocation4 + $0x8] sm:$0xff]  ;;  %s852_s0 = smov 1   ;;  %s853_s27 = smov 15   ;;  %v753_v7 = vpack.i.bf16 %v850_v0, %v899_v2  ;;  %v857_v10 = vmov 0   ;;  %vm129_vm0 = vcmask 7168  }
  0x15   :  { %694 = vrot.lane.b32.xlu1 %v850_v0, %s849_s23  ;;  %689 = vrot.lane.b32.xlu0 %v850_v0, %s851_s26  ;;  %v698_v6 = vpack.i.bf16 %v905_v5, %v901_v3  ;;  %v748_v8 = vpack.i.bf16 %v850_v0, %v905_v5  ;;  %s854_s28 = smov 127   ;;  %v758_v9 = vpack.i.bf16 %v897_v1, %v901_v3  ;;  %s855_s29 = smov 113   ;;  %v426_v11 = vld [vmem:[%s1045_s2] sm:$0xff]  ;;  %v922_v13 = vand.u32 127, %v29_v12 }
  0x16   :  { %s856_s30 = smov 112   ;;  %798 = vset.pattern.permute.xlu0 %v857_v10  ;;  %s858_s4 = smov 111   ;;  %vm68_vm1 = vcmask 138240   ;;  %vm89_vm2 = vcmask 130048   ;;  %vm108_vm3 = vcmask 121856   ;;  %vm859_vm7 = vmmov 1  }
  0x17   :  { %v31_v14 = vadd.s32 128, %v922_v13  ;;  %v32_v17 = vand.u32 15, %v922_v13  ;;  %vm154_vm12 = vcmask 1039360   ;;  %s860_s8 = smov [#allocation7]  }
  0x18   :  { %s588_s9 = sshll.u32 %s860_s8, 4  ;;  %s589_s9 = int_to_ptr.vmem [resolvable:$true] %s588_s9 }
  0x19   :  { %709 = vrot.lane.b32.xlu1 %v708_v4, %s851_s26  ;;  %699 = vrot.lane.b32.xlu0 %v698_v6, %s851_s26  ;;  %v33_v18 = vand.u32 15, %v31_v14  ;;  %v926_v19 = vadd.s32 4294967295, %v32_v17  ;;  %p826_p9 = scmp.lt.s32.totalorder %s589_s9, %s589_s9 }
  0x1b   :  { %v35_v21 = vadd.s32 4294967295, %v33_v18  ;;  %v928_v22 = vadd.s32 1, %v33_v18  ;;  %vm36_vm4 = vcmp.ge.s32.totalorder %v926_v19, 0 }
  0x1c   :  { %vm949_vm9 = vmpackc.low %vm859_vm7, %vm36_vm4 }
  0x1d   :  { %714 = vrot.lane.b32.xlu1 %v708_v4, %s849_s23  ;;  %704 = vrot.lane.b32.xlu0 %v698_v6, %s849_s23  ;;  %vm37_vm5 = vcmp.ge.s32.totalorder %v35_v21, 0  ;;  %vm47_vm6 = vcmp.lt.s32.totalorder %v928_v22, 16 }
  0x1e   :  { %vm937_vm8 = vmpackc.low %vm859_vm7, %vm37_vm5 }
  0x1f   :  { %vm966_vm10 = vmpackc.low %vm37_vm5, %vm47_vm6 }
  0x20   :  { %vm639_vm14 = vmpackc.low %vm47_vm6, %vm859_vm7 }
  0x21   :  { %724 = vrot.lane.b32.xlu1 %v698_v6, %s852_s0  ;;  %719 = vrot.lane.b32.xlu0 %v698_v6, %s853_s27  ;;  %v970_v6 = vadd.s32 1, %v32_v17 }
  0x23   :  { %vm46_vm11 = vcmp.lt.s32.totalorder %v970_v6, 16 }
  0x24   :  { %vm636_vm13 = vmpackc.low %vm36_vm4, %vm46_vm11 }
  0x25   :  { %734 = vrot.lane.b32.xlu1 %v708_v4, %s852_s0  ;;  %729 = vrot.lane.b32.xlu0 %v708_v4, %s853_s27  ;;  %vm642_vm15 = vmpackc.low %vm46_vm11, %vm859_vm7 }
  0x29   :  { %744 = vrot.lane.b32.xlu1 %v850_v0, %s852_s0  ;;  %739 = vrot.lane.b32.xlu0 %v850_v0, %s853_s27 }
  0x2d   :  { %754 = vrot.lane.b32.xlu1 %v753_v7, %s854_s28  ;;  %749 = vrot.lane.b32.xlu0 %v748_v8, %s854_s28 }
  0x31   :  { %764 = vrot.lane.b32.xlu1 %v748_v8, %s855_s29  ;;  %759 = vrot.lane.b32.xlu0 %v758_v9, %s854_s28 }
  0x35   :  { %774 = vrot.lane.b32.xlu1 %v753_v7, %s855_s29  ;;  %769 = vrot.lane.b32.xlu0 %v748_v8, %s856_s30 }
  0x39   :  { %784 = vrot.lane.b32.xlu1 %v758_v9, %s855_s29  ;;  %779 = vrot.lane.b32.xlu0 %v753_v7, %s856_s30 }
  0x3d   :  { %211 = vrot.lane.b32.xlu1 %v905_v5, %s858_s4  ;;  %789 = vrot.lane.b32.xlu0 %v758_v9, %s856_s30 }
  0x41   :  { %377 = vrot.lane.b32.xlu1 %v899_v2, %s858_s4  ;;  %794 = vrot.lane.b32.xlu0 %v850_v0, %s858_s4 }
  0x45   :  { %375 = vrot.lane.b32.xlu1 %v897_v1, %s858_s4  ;;  %209 = vrot.lane.b32.xlu0 %v901_v3, %s858_s4 }
  0x49   :  { %429 = vperm.xlu0 %798, %v426_v11  }
  0x87   :  { %v695_v15 = vpop.permute.xlu1 %694  ;;  %v690_v16 = vpop.permute.xlu0 %689 }
  0x88   :  { %v697_v28 = vunpack.i.h.bf16 %v695_v15  ;;  %v692_v29 = vunpack.i.h.bf16 %v690_v16  ;;  %v696_v31 = vunpack.i.l.bf16 %v695_v15  ;;  %v691_v32 = vunpack.i.l.bf16 %v690_v16 }
  0x8b   :  { %v710_v20 = vpop.permute.xlu1 %709  ;;  %v700_v23 = vpop.permute.xlu0 %699 }
  0x8c   :  { %v712_v24 = vunpack.i.h.bf16 %v710_v20  ;;  %v711_v25 = vunpack.i.l.bf16 %v710_v20  ;;  %v702_v26 = vunpack.i.h.bf16 %v700_v23  ;;  %v701_v27 = vunpack.i.l.bf16 %v700_v23 }
  0x8e   :  { %v242_v38 = vsel %vm68_vm1, %v711_v25, %v712_v24  ;;  %v241_v39 = vsel %vm68_vm1, %v692_v29, %v711_v25  ;;  %v70_v40 = vsel %vm68_vm1, %v701_v27, %v702_v26  ;;  %v69_v43 = vsel %vm68_vm1, %v691_v32, %v701_v27 }
  0x8f   :  { %v715_v30 = vpop.permute.xlu1 %714  ;;  %v705_v35 = vpop.permute.xlu0 %704  ;;  %vm196_vm1 = vcmask 916480  }
  0x90   :  { %v717_v33 = vunpack.i.h.bf16 %v715_v30  ;;  %v716_v34 = vunpack.i.l.bf16 %v715_v30  ;;  %v707_v36 = vunpack.i.h.bf16 %v705_v35  ;;  %v706_v37 = vunpack.i.l.bf16 %v705_v35 }
  0x92   :  { %v262_v42 = vsel %vm89_vm2, %v716_v34, %v717_v33  ;;  %v261_v44 = vsel %vm89_vm2, %v697_v28, %v716_v34  ;;  %v91_v46 = vsel %vm89_vm2, %v706_v37, %v707_v36  ;;  %v90_v48 = vsel %vm89_vm2, %v696_v31, %v706_v37 }
  0x93   :  { %v725_v45 = vpop.permute.xlu1 %724  ;;  %v650_v47 = vpack.c.bf16 %v262_v42, %v242_v38  ;;  %v653_v50 = vpack.c.bf16 %v261_v44, %v241_v39  ;;  %v720_v53 = vpop.permute.xlu0 %719  ;;  %v626_v54 = vpack.c.bf16 %v91_v46, %v70_v40  ;;  %v629_v55 = vpack.c.bf16 %v90_v48, %v69_v43 }
  0x94   :  { %v727_v51 = vunpack.i.h.bf16 %v725_v45  ;;  %v726_v52 = vunpack.i.l.bf16 %v725_v45  ;;  %v722_v56 = vunpack.i.h.bf16 %v720_v53  ;;  %v721_v57 = vunpack.i.l.bf16 %v720_v53 }
  0x95   :  { %652 = vmatprep.subr.msk.bf16.mxu1 %vm937_vm8, %v650_v47  ;;  %628 = vmatprep.subr.msk.bf16.mxu0 %vm937_vm8, %v626_v54  ;;  %vm215_vm2 = vcmask 908288  }
  0x96   :  { %v131_v58 = vsel %vm129_vm0, %v726_v52, %v727_v51  ;;  %655 = vmatpush1.bf16.msk.msra.mxu1 %vm949_vm9, %v653_v50  ;;  %v110_v59 = vsel %vm108_vm3, %v721_v57, %v722_v56  ;;  %631 = vmatpush1.bf16.msk.msra.mxu0 %vm949_vm9, %v629_v55 }
  0x97   :  { %v735_v60 = vpop.permute.xlu1 %734  ;;  %v632_v62 = vpack.c.bf16 %v131_v58, %v110_v59  ;;  %v730_v4 = vpop.permute.xlu0 %729 }
  0x98   :  { %v737_v63 = vunpack.i.h.bf16 %v735_v60  ;;  %v736_v0 = vunpack.i.l.bf16 %v735_v60  ;;  %v732_v7 = vunpack.i.h.bf16 %v730_v4  ;;  %v731_v8 = vunpack.i.l.bf16 %v730_v4 }
  0x99   :  { %634 = vmatprep.subr.msk.bf16.mxu0 %vm966_vm10, %v632_v62 }
  0x9a   :  { %v300_v9 = vsel %vm129_vm0, %v736_v0, %v737_v63  ;;  %v280_v10 = vsel %vm108_vm3, %v731_v8, %v732_v7 }
  0x9b   :  { %v745_v11 = vpop.permute.xlu1 %744  ;;  %v656_v12 = vpack.c.bf16 %v300_v9, %v280_v10  ;;  %v740_v15 = vpop.permute.xlu0 %739 }
  0x9c   :  { %v747_v13 = vunpack.i.h.bf16 %v745_v11  ;;  %v746_v14 = vunpack.i.l.bf16 %v745_v11  ;;  %v742_v16 = vunpack.i.h.bf16 %v740_v15  ;;  %v741_v18 = vunpack.i.l.bf16 %v740_v15 }
  0x9d   :  { %658 = vmatprep.subr.msk.bf16.mxu1 %vm966_vm10, %v656_v12 }
  0x9e   :  { %v130_v17 = vsel %vm129_vm0, %v746_v14, %v726_v52  ;;  %v299_v20 = vsel %vm129_vm0, %v747_v13, %v736_v0  ;;  %v109_v21 = vsel %vm108_vm3, %v741_v18, %v721_v57  ;;  %v279_v23 = vsel %vm108_vm3, %v742_v16, %v731_v8 }
  0x9f   :  { %v755_v24 = vpop.permute.xlu1 %754  ;;  %v635_v25 = vpack.c.bf16 %v130_v17, %v109_v21  ;;  %v659_v26 = vpack.c.bf16 %v299_v20, %v279_v23  ;;  %v750_v29 = vpop.permute.xlu0 %749  ;;  %vm175_vm0 = vcmask 924672   ;;  %v389_v21 = vld [vmem:[%s1044_s1] sm:$0xff]  ;;  %vm432_vm3 = vcmask 588800   ;;  %s821_s1 = scalar_lea.vmem %s589_s9, 512 }
  0xa0   :  { %v757_v27 = vunpack.i.h.bf16 %v755_v24  ;;  %v756_v28 = vunpack.i.l.bf16 %v755_v24  ;;  %v752_v30 = vunpack.i.h.bf16 %v750_v29  ;;  %v751_v31 = vunpack.i.l.bf16 %v750_v29  ;;  %p822_p8 = scmp.ne.s32.totalorder %s589_s9, %s821_s1  ;;  %p827_p10 = scmp.lt.s32.totalorder %s821_s1, %s821_s1 }
  0xa1   :  { %637 = vmatpush1.bf16.msk.msra.mxu0 %vm636_vm13, %v635_v25  ;;  %661 = vmatpush1.bf16.msk.msra.mxu1 %vm636_vm13, %v659_v26 }
  0xa2   :  { %v324_v32 = vsel %vm154_vm12, %v756_v28, %v757_v27  ;;  %v156_v19 = vsel %vm154_vm12, %v751_v31, %v752_v30  ;;  %p828_p11 = por %p827_p10, %p826_p9 }
  0xa3   :  { %v662_v33 = vpack.c.bf16 %v324_v32, %v899_v2  ;;  %v765_v34 = vpop.permute.xlu1 %764  ;;  %v638_v35 = vpack.c.bf16 %v156_v19, %v905_v5  ;;  %v760_v36 = vpop.permute.xlu0 %759 }
  0xa4   :  { %v762_v37 = vunpack.i.h.bf16 %v760_v36  ;;  %v761_v38 = vunpack.i.l.bf16 %v760_v36  ;;  %v767_v39 = vunpack.i.h.bf16 %v765_v34  ;;  %v766_v40 = vunpack.i.l.bf16 %v765_v34  ;;  %p829_p12 = pnand %p828_p11, %p822_p8 }
  0xa5   :  { %664 = vmatprep.subr.msk.bf16.mxu1 %vm639_vm14, %v662_v33  ;;  %640 = vmatprep.subr.msk.bf16.mxu0 %vm639_vm14, %v638_v35 }
  0xa6   :  { %v323_v42 = vsel %vm154_vm12, %v762_v37, %v756_v28  ;;  %v155_v43 = vsel %vm154_vm12, %v761_v38, %v751_v31  ;;  %v177_v48 = vsel %vm175_vm0, %v766_v40, %v767_v39 }
  0xa7   :  { %v775_v44 = vpop.permute.xlu1 %774  ;;  %v665_v2 = vpack.c.bf16 %v323_v42, %v897_v1  ;;  %v641_v5 = vpack.c.bf16 %v155_v43, %v901_v3  ;;  %v770_v45 = vpop.permute.xlu0 %769 }
  0xa8   :  { %v772_v46 = vunpack.i.h.bf16 %v770_v45  ;;  %v771_v47 = vunpack.i.l.bf16 %v770_v45  ;;  %v777_v50 = vunpack.i.h.bf16 %v775_v44  ;;  %v776_v51 = vunpack.i.l.bf16 %v775_v44 }
  0xa9   :  { %643 = vmatpush1.bf16.msk.msra.mxu0 %vm642_vm15, %v641_v5  ;;  %667 = vmatpush1.bf16.msk.msra.mxu1 %vm642_vm15, %v665_v2 }
  0xaa   :  { %v198_v52 = vsel %vm196_vm1, %v771_v47, %v772_v46  ;;  %v344_v1 = vsel %vm175_vm0, %v776_v51, %v777_v50 }
  0xab   :  { %v785_v53 = vpop.permute.xlu1 %784  ;;  %v644_v54 = vpack.c.bf16 %v198_v52, %v177_v48  ;;  %v780_v55 = vpop.permute.xlu0 %779 }
  0xac   :  { %v782_v56 = vunpack.i.h.bf16 %v780_v55  ;;  %v781_v57 = vunpack.i.l.bf16 %v780_v55  ;;  %v787_v3 = vunpack.i.h.bf16 %v785_v53  ;;  %v786_v58 = vunpack.i.l.bf16 %v785_v53 }
  0xad   :  { %646 = vmatprep.subr.msk.bf16.mxu0 %vm937_vm8, %v644_v54 }
  0xae   :  { %v364_v59 = vsel %vm196_vm1, %v781_v57, %v782_v56  ;;  %v176_v4 = vsel %vm175_vm0, %v786_v58, %v766_v40  ;;  %v343_v7 = vsel %vm175_vm0, %v787_v3, %v776_v51 }
  0xaf   :  { %v212_v60 = vpop.permute.xlu1 %211  ;;  %v668_v61 = vpack.c.bf16 %v364_v59, %v344_v1  ;;  %v790_v62 = vpop.permute.xlu0 %789 }
  0xb0   :  { %v792_v63 = vunpack.i.h.bf16 %v790_v62  ;;  %v791_v0 = vunpack.i.l.bf16 %v790_v62 }
  0xb1   :  { %670 = vmatprep.subr.msk.bf16.mxu1 %vm937_vm8, %v668_v61 }
  0xb2   :  { %v197_v8 = vsel %vm196_vm1, %v791_v0, %v771_v47  ;;  %v363_v9 = vsel %vm196_vm1, %v792_v63, %v781_v57 }
  0xb3   :  { %v378_v10 = vpop.permute.xlu1 %377  ;;  %v647_v11 = vpack.c.bf16 %v197_v8, %v176_v4  ;;  %v671_v12 = vpack.c.bf16 %v363_v9, %v343_v7  ;;  %v795_v13 = vpop.permute.xlu0 %794 }
  0xb4   :  { %v797_v14 = vunpack.i.h.bf16 %v795_v13  ;;  %v796_v15 = vunpack.i.l.bf16 %v795_v13 }
  0xb5   :  { %649 = vmatpush1.bf16.msk.msra.mxu0 %vm949_vm9, %v647_v11  ;;  %673 = vmatpush1.bf16.msk.msra.mxu1 %vm949_vm9, %v671_v12 }
  0xb6   :  { %v217_v16 = vsel %vm215_vm2, %v212_v60, %v796_v15  ;;  %v382_v18 = vsel %vm215_vm2, %v378_v10, %v797_v14 }
  0xb7   :  { %v376_v41 = vpop.permute.xlu1 %375  ;;  %v210_v20 = vpop.permute.xlu0 %209  ;;  %612 = vmatprep.subr.msk.mxu0 %vm47_vm6, %v217_v16  ;;  %624 = vmatprep.subr.msk.mxu1 %vm47_vm6, %v382_v18 }
  0xb8   :  { %v381_v17 = vsel %vm215_vm2, %v376_v41, %v378_v10  ;;  %v216_v23 = vsel %vm215_vm2, %v210_v20, %v212_v60 }
  0xb9   :  { %613 = vmatpush1.msk.msra.mxu0 %vm46_vm11, %v216_v23  ;;  %625 = vmatpush1.msk.msra.mxu1 %vm46_vm11, %v381_v17 }
  0xba   :  { %600 = vmatmul.mubr.msk.f32.vlgmr.msra.gmra.mrb[0].mxu0 %vm432_vm3, %v389_v21  ;;  %601 = vmatmul.mubr.msk.f32.vlgmr.msra.gmra.mrb[0].mxu1 %vm432_vm3, %v389_v21 }
  0xc8   :  { %v430_v49 = vpop.permute.xlu0 %429 }
 0x18d   :  { %v502_v24 = vpop.f32.mrb[0].mxu0  ;;  %v573_v22 = vpop.f32.mrb[0].mxu1 }
 0x18e   :  { %v503_v25 = vadd.f32 %v502_v24, %v430_v49  ;;  %v574_v26 = vadd.f32 %v573_v22, %v430_v49  ;;  %v504_v27 = vpop.f32.mrb[1].mxu0  ;;  %v575_v28 = vpop.f32.mrb[1].mxu1 }
 0x18f   :  { %v505_v29 = vadd.f32 %v504_v27, %v430_v49  ;;  %v576_v30 = vadd.f32 %v575_v28, %v430_v49 }
 0x190   :  { %578 = vst [vmem:[#allocation7] sm:$0xff] %v503_v25  ;;  %581 = vst [vmem:[#allocation7 + $0x10] sm:$0xff] %v574_v26 }
 0x191   :  { %579 = vst [vmem:[#allocation7 + $0x8] sm:$0xff] %v505_v29  ;;  %582 = vst [vmem:[#allocation7 + $0x18] sm:$0xff] %v576_v30 }
 0x192   :  { %832 = shalt.err (!%p829_p12)
}
 0x193   :  { %s833_s12 = scalar_lea.hbm %s1046_s3, 512 }
 0x194   :  { %p834_p13 = scmp.ne.s32.totalorder %s1046_s3, %s833_s12  ;;  %p837_p0 = scmp.lt.u32.totalorder %s833_s12, %s1046_s3 }
 0x196   :  { %p839_p1 = pnand %p837_p0, %p834_p13 }
 0x198   :  { %842 = shalt.err (!%p839_p1)
}
 0x199   :  { %594 = dma.vmem_to_hbm [thread:$0]  %s589_s9, 512, %s1046_s3, [#allocation6], %s848_s22, %s848_s22, %s849_s23  }
 0x19a   :  { %845 = dma.done.wait [#allocation6], 512  }
 0x19b   :  { %846 = vsyncadd [#allocation6], 4294966784 }
 0x19c   :  { %598 = vsyncpa [#allocation5], 1 }
 0x19d   :  { %599 = vsyncpa [#allocation6], 1 }

</bundles_post_ra>
